<compile_context>
chip_gen: v6e
topology: v6e:2x2x1
jax: 0.10.0
libtpu: 0.0.40
codegen_flags: <defaults>
</compile_context>

<pallas_src>
import jax
import jax.numpy as jnp
from jax.experimental import pallas as pl
from jax.experimental.pallas import tpu as pltpu

_LANE = 128
_SUBLANE = 8


def _erf(z):
    # Abramowitz & Stegun 7.1.26 polynomial (|err| <= ~1.5e-7), using only
    # exp / mul / add / where so it needs no erf primitive lowering.
    a1, a2, a3, a4, a5 = (0.254829592, -0.284496736, 1.421413741,
                          -1.453152027, 1.061405429)
    p = 0.3275911
    az = jnp.abs(z)
    t = 1.0 / (1.0 + p * az)
    poly = ((((a5 * t + a4) * t + a3) * t + a2) * t + a1) * t
    e = 1.0 - poly * jnp.exp(-az * az)
    return jnp.where(z >= 0, e, -e)


def _gelu_exact(y):
    # Exact (erf) GELU, matching PyTorch nn.GELU(approximate='none').
    return 0.5 * y * (1.0 + _erf(y * 0.7071067811865476))


def _residual_add_kernel(x_ref, w_ref, b_ref, o_ref):
    # x_ref: (TM, Hp) bf16 tile  (residual input and matmul LHS, pipelined)
    # w_ref: (Hp, Hp) bf16       (VMEM-resident across the whole grid)
    # b_ref: (1,  Hp) f32        (VMEM-resident; already f32, no per-step cast)
    # o_ref: (TM, Hp)            output tile
    x = x_ref[...]
    y = jnp.dot(x, w_ref[...], preferred_element_type=jnp.float32)   # MXU, f32 acc
    y = y + b_ref[...]
    y = _gelu_exact(y)                                                # fn(x)
    o_ref[...] = (y + x.astype(jnp.float32)).astype(o_ref.dtype)      # + residual


def _round_up(v, m):
    return (v + m - 1) // m * m


def residual_add(x, w, b, *, block_m=None, compute_dtype=jnp.bfloat16):
    """out = gelu_exact(x @ w + b) + x fused in one Pallas TPU kernel.

    x: (B, S, H), w: (H, H), b: (H,)
    """
    B, S, H = x.shape
    M = B * S
    out_dtype = x.dtype

    # Lane-dense padding: keep the last (lane) dim a multiple of 128 so the
    # output store is a full-width, unmasked vst. Zero padding is exact.
    Hp = max(_LANE, _round_up(H, _LANE))
    x2d = x.reshape(M, H)
    if Hp != H:
        x2d = jnp.pad(x2d, ((0, 0), (0, Hp - H)))
        w = jnp.pad(w, ((0, Hp - H), (0, Hp - H)))
        b = jnp.pad(b, ((0, Hp - H),))

    # bf16 operands for the MXU; f32 bias (cast folded into the wrapper).
    x2d = x2d.astype(compute_dtype)
    w = w.astype(compute_dtype)
    b2d = b.reshape(1, Hp).astype(jnp.float32)

    in_itemsize = jnp.dtype(compute_dtype).itemsize
    out_itemsize = jnp.dtype(out_dtype).itemsize
    resident = Hp * Hp * in_itemsize + Hp * 4           # weight + bias (VMEM-resident)
    budget = 32 * 1024 * 1024                           # conservative across v5e/v6e/v7x

    if block_m is None:
        per_row = 2 * Hp * (in_itemsize + out_itemsize)  # double-buffered x + out tiles
        tm = max((budget - resident) // per_row, _SUBLANE)
        tm = min(int(tm), 512, M)
        if tm >= _SUBLANE:
            tm = (tm // _SUBLANE) * _SUBLANE
        block_m = max(tm, 1)
    block_m = min(block_m, M)
    if M > _SUBLANE:
        block_m = max((block_m // _SUBLANE) * _SUBLANE, _SUBLANE)

    grid = (pl.cdiv(M, block_m),)

    vmem_need = resident + 2 * block_m * Hp * (in_itemsize + out_itemsize)
    vmem_limit = int(min(64 * 1024 * 1024, max(32 * 1024 * 1024, 2 * vmem_need)))

    out2d = pl.pallas_call(
        _residual_add_kernel,
        out_shape=jax.ShapeDtypeStruct((M, Hp), out_dtype),
        grid=grid,
        in_specs=[
            pl.BlockSpec((block_m, Hp), lambda i: (i, 0)),   # x tile (pipelined)
            pl.BlockSpec((Hp, Hp), lambda i: (0, 0)),        # weight (resident)
            pl.BlockSpec((1, Hp), lambda i: (0, 0)),         # bias (resident)
        ],
        out_specs=pl.BlockSpec((block_m, Hp), lambda i: (i, 0)),
        compiler_params=pltpu.CompilerParams(
            dimension_semantics=("parallel",),   # row tiles are independent
            vmem_limit_bytes=vmem_limit,
        ),
    )(x2d, w, b2d)

    if Hp != H:
        out2d = out2d[:, :H]
    return out2d.reshape(B, S, H)


def _reference(x, w, b):
    # Mirrors the kernel's bf16 operand rounding; math in f32; exact-erf GELU.
    xb = x.astype(jnp.bfloat16).astype(jnp.float32)
    wb = w.astype(jnp.bfloat16).astype(jnp.float32)
    y = jnp.einsum("bsh,hk->bsk", xb, wb) + b.astype(jnp.float32)
    y = jax.nn.gelu(y, approximate=False)
    return (y + xb).astype(x.dtype)


if __name__ == "__main__":
    B, S, H = 2, 8, 32
    key = jax.random.PRNGKey(0)
    kx, kw, kb = jax.random.split(key, 3)

    x = jax.random.normal(kx, (B, S, H), dtype=jnp.float32)
    # Deterministic parameter init for fn = Linear(H, H)
    w = jax.random.normal(kw, (H, H), dtype=jnp.float32) * (1.0 / jnp.sqrt(H))
    b = jax.random.normal(kb, (H,), dtype=jnp.float32) * 0.01

    # block_m=8 forces 2 grid steps even at this tiny test shape so the
    # pipelined (tiled-M) path is exercised.
    out = residual_add(x, w, b, block_m=8)
    jax.block_until_ready(out)

    ref = _reference(x, w, b)
    assert out.shape == (B, S, H), out.shape
    max_err = float(jnp.max(jnp.abs(out - ref)))
    assert jnp.allclose(out, ref, atol=1e-3, rtol=1e-3), f"mismatch vs reference: {max_err}"

    print("KERNEL_OK")
</pallas_src>

<mosaic_0001>
module attributes {stable_mosaic.version = 11 : i64} {
  func.func @_residual_add_kernel(%arg0: i32, %arg1: memref<8x128xbf16, #tpu.memory_space<vmem>>, %arg2: memref<128x128xbf16, #tpu.memory_space<vmem>>, %arg3: memref<1x128xf32, #tpu.memory_space<vmem>>, %arg4: memref<8x128xf32, #tpu.memory_space<vmem>>) attributes {dimension_semantics = [#tpu.dimension_semantics<parallel>], iteration_bounds = array<i64: 2>, scalar_prefetch = 0 : i64, scratch_operands = 0 : i64, tpu.core_type = #tpu.core_type<tc>, window_params = [{transform_indices = @transform_0, window_bounds = array<i64: 8, 128>}, {pipeline_mode = #tpu.pipeline_mode<synchronous>, transform_indices = @transform_1, window_bounds = array<i64: 128, 128>}, {pipeline_mode = #tpu.pipeline_mode<synchronous>, transform_indices = @transform_2, window_bounds = array<i64: 1, 128>}, {transform_indices = @transform_3, window_bounds = array<i64: 8, 128>}]} {
    %c0 = arith.constant 0 : index
    %c0_0 = arith.constant 0 : index
    %0 = vector.load %arg1[%c0, %c0_0] : memref<8x128xbf16, #tpu.memory_space<vmem>>, vector<8x128xbf16>
    %c0_1 = arith.constant 0 : index
    %c0_2 = arith.constant 0 : index
    %1 = vector.load %arg2[%c0_1, %c0_2] : memref<128x128xbf16, #tpu.memory_space<vmem>>, vector<128x128xbf16>
    %cst = arith.constant dense<0.000000e+00> : vector<8x128xf32>
    %2 = tpu.matmul %0, %1, %cst {dimension_numbers = #tpu.dot_dimension_numbers<[1], [0], [0], [1], [0, 0, 1, 1], [], []>} : vector<8x128xbf16>, vector<128x128xbf16>, vector<8x128xf32> -> vector<8x128xf32>
    %c0_3 = arith.constant 0 : index
    %c0_4 = arith.constant 0 : index
    %3 = vector.load %arg3[%c0_3, %c0_4] : memref<1x128xf32, #tpu.memory_space<vmem>>, vector<1x128xf32>
    %4 = vector.broadcast %3 : vector<1x128xf32> to vector<8x128xf32>
    %5 = arith.addf %2, %4 : vector<8x128xf32>
    %cst_5 = arith.constant 5.000000e-01 : f32
    %6 = vector.broadcast %cst_5 : f32 to vector<8x128xf32>
    %7 = arith.mulf %6, %5 : vector<8x128xf32>
    %cst_6 = arith.constant 0.707106769 : f32
    %8 = vector.broadcast %cst_6 : f32 to vector<8x128xf32>
    %9 = arith.mulf %5, %8 : vector<8x128xf32>
    %10 = math.absf %9 : vector<8x128xf32>
    %cst_7 = arith.constant 0.327591091 : f32
    %11 = vector.broadcast %cst_7 : f32 to vector<8x128xf32>
    %12 = arith.mulf %11, %10 : vector<8x128xf32>
    %cst_8 = arith.constant 1.000000e+00 : f32
    %13 = vector.broadcast %cst_8 : f32 to vector<8x128xf32>
    %14 = arith.addf %13, %12 : vector<8x128xf32>
    %cst_9 = arith.constant 1.000000e+00 : f32
    %15 = vector.broadcast %cst_9 : f32 to vector<8x128xf32>
    %16 = arith.divf %15, %14 : vector<8x128xf32>
    %cst_10 = arith.constant 1.06140542 : f32
    %17 = vector.broadcast %cst_10 : f32 to vector<8x128xf32>
    %18 = arith.mulf %17, %16 : vector<8x128xf32>
    %cst_11 = arith.constant -1.45315206 : f32
    %19 = vector.broadcast %cst_11 : f32 to vector<8x128xf32>
    %20 = arith.addf %18, %19 : vector<8x128xf32>
    %21 = arith.mulf %20, %16 : vector<8x128xf32>
    %cst_12 = arith.constant 1.42141378 : f32
    %22 = vector.broadcast %cst_12 : f32 to vector<8x128xf32>
    %23 = arith.addf %21, %22 : vector<8x128xf32>
    %24 = arith.mulf %23, %16 : vector<8x128xf32>
    %cst_13 = arith.constant -0.284496725 : f32
    %25 = vector.broadcast %cst_13 : f32 to vector<8x128xf32>
    %26 = arith.addf %24, %25 : vector<8x128xf32>
    %27 = arith.mulf %26, %16 : vector<8x128xf32>
    %cst_14 = arith.constant 0.254829586 : f32
    %28 = vector.broadcast %cst_14 : f32 to vector<8x128xf32>
    %29 = arith.addf %27, %28 : vector<8x128xf32>
    %30 = arith.mulf %29, %16 : vector<8x128xf32>
    %cst_15 = arith.constant 0.000000e+00 : f32
    %31 = vector.broadcast %cst_15 : f32 to vector<8x128xf32>
    %32 = arith.subf %31, %10 : vector<8x128xf32>
    %33 = arith.mulf %32, %10 : vector<8x128xf32>
    %34 = math.exp %33 : vector<8x128xf32>
    %35 = arith.mulf %30, %34 : vector<8x128xf32>
    %cst_16 = arith.constant 1.000000e+00 : f32
    %36 = vector.broadcast %cst_16 : f32 to vector<8x128xf32>
    %37 = arith.subf %36, %35 : vector<8x128xf32>
    %cst_17 = arith.constant 0.000000e+00 : f32
    %38 = vector.broadcast %cst_17 : f32 to vector<8x128xf32>
    %39 = arith.cmpf oge, %9, %38 : vector<8x128xf32>
    %cst_18 = arith.constant 0.000000e+00 : f32
    %40 = vector.broadcast %cst_18 : f32 to vector<8x128xf32>
    %41 = arith.subf %40, %37 : vector<8x128xf32>
    %42 = arith.select %39, %37, %41 : vector<8x128xi1>, vector<8x128xf32>
    %cst_19 = arith.constant 1.000000e+00 : f32
    %43 = vector.broadcast %cst_19 : f32 to vector<8x128xf32>
    %44 = arith.addf %43, %42 : vector<8x128xf32>
    %45 = arith.mulf %7, %44 : vector<8x128xf32>
    %46 = arith.extf %0 : vector<8x128xbf16> to vector<8x128xf32>
    %47 = arith.addf %45, %46 : vector<8x128xf32>
    %c0_20 = arith.constant 0 : index
    %c0_21 = arith.constant 0 : index
    %48 = vector.load %arg4[%c0_20, %c0_21] : memref<8x128xf32, #tpu.memory_space<vmem>>, vector<8x128xf32>
    tpu.vector_store %arg4[%c0_20, %c0_21], %47 {strides = array<i32>} : memref<8x128xf32, #tpu.memory_space<vmem>>, vector<8x128xf32>,
    return
  }
  func.func @transform_0(%arg0: i32) -> (i32, i32) {
    %c0_i32 = arith.constant 0 : i32
    %c0_i32_0 = arith.constant 0 : i32
    return %arg0, %c0_i32 : i32, i32
  }
  func.func @transform_1(%arg0: i32) -> (i32, i32) {
    %c0_i32 = arith.constant 0 : i32
    %c0_i32_0 = arith.constant 0 : i32
    %c0_i32_1 = arith.constant 0 : i32
    return %c0_i32, %c0_i32_0 : i32, i32
  }
  func.func @transform_2(%arg0: i32) -> (i32, i32) {
    %c0_i32 = arith.constant 0 : i32
    %c0_i32_0 = arith.constant 0 : i32
    %c0_i32_1 = arith.constant 0 : i32
    return %c0_i32, %c0_i32_0 : i32, i32
  }
  func.func @transform_3(%arg0: i32) -> (i32, i32) {
    %c0_i32 = arith.constant 0 : i32
    %c0_i32_0 = arith.constant 0 : i32
    return %arg0, %c0_i32 : i32, i32
  }
}

</mosaic_0001>

<bundles_post_ra>
// kernel: tpu_custom_call.1
= control target key start
LH: loop header
LB: loop body
LE: loop exit
PB: predicated region body
PF: predicated region fallthrough
CT: control target
= control target key end

     0   :  { %8 = vsyncpa [#allocation3], 0  ;;  %s875_s0 = inlined_call_operand.hbm [shape: bf16[16,128], index: 0, kind: input, shape index: {}]   ;;  %s876_s1 = inlined_call_operand.hbm [shape: bf16[128,128], index: 1, kind: input, shape index: {}]   ;;  %s877_s2 = inlined_call_operand.vmem [shape: f32[1,128], index: 2, kind: input, shape index: {}]   ;;  %s878_s3 = inlined_call_operand.hbm [shape: f32[16,128], index: 3, kind: output, shape index: {}]  }
   0x1   :  { %10 = vsyncpa [#allocation3 + $0x1], 0 }
   0x2   :  { %11 = vsyncpa [#allocation6], 0 }
   0x3   :  { %12 = vsyncpa [#allocation4], 0 }
   0x4   :  { %14 = vsyncpa [#allocation4 + $0x1], 0  ;;  %s714_s12 = smov 0   ;;  %s716_s13 = smov 0  }
   0x5   :  { %s718_s14 = smov 0   ;;  %s720_s15 = smov 0  }
   0x6 LB: > { %s735_s16 = sadd.s32 4294967295, %s685_s15   ;;  %s438_s17 = sadd.s32 4294967294, %s685_s15   ;;  %s685_s15 = sphi %s720_s15, %s900_s15   ;;  %s681_s14 = sphi %s718_s14, %s899_s14   ;;  %s677_s13 = sphi %s716_s13, %s898_s13   ;;  %s673_s12 = sphi %s714_s12, %s897_s12  }
   0x7   : > { %p40_p0 = scmp.ne.s32.totalorder %s677_s13, %s673_s12  ;;  %p879_p1 = scmp.eq.s32.totalorder %s735_s16, 0 }
   0x8   : > { %p112_p3 = scmp.eq.s32.totalorder %s438_s17, 1  ;;  %p439_p5 = scmp.ge.s32.totalorder %s685_s15, 1 }
   0x9   : > { %p744_p4 = por %p879_p1, %p40_p0  ;;  %p119_p7 = scmp.lt.s32.totalorder %s685_s15, 3 }
   0xa   : > { %p749_p6 = por %p112_p3, %p40_p0  ;;  %s687_s21 = smov [#allocation5]  }
   0xb   : > { %s883_s18 = scalar_select %p744_p4, 1, 0 }
   0xc   : > { %s884_s19 = scalar_select %p749_p6, 1, 0 }
   0xd   : > { %p754_p8 = pnand %p439_p5, %p119_p7  ;;  %s131_s22 = sshll.u32 %s687_s21, 4  ;;  %s132_s22 = int_to_ptr.vmem [resolvable:$true] %s131_s22 }
   0xe   : > { %s768_s24 = sadd.s32 1, %s685_s15   ;;  %s27_s25 = sadd.s32 1, %s681_s14 }
   0xf   : > { %s885_s20 = scalar_select %p754_p8, 1, 0 }
  0x10   : > { %p498_p9 = pneg %p754_p8  ;;  %s24_s26 = ssub.s32 %s685_s15, %s768_s24 }
  0x11   : > { %s574_s27 = scalar_lea.vmem %s132_s22, 1024  ;;  %p582_p5 = scmp.lt.s32.totalorder %s132_s22, %s132_s22 }
  0x12   : > { %p763_p11 = pnand %p498_p9, %p879_p1  ;;  %p575_p13 = scmp.ne.s32.totalorder %s132_s22, %s574_s27 }
  0x13   : > { %p583_p7 = scmp.lt.s32.totalorder %s574_s27, %s574_s27 }
  0x14   : > { %p565_p12 = pneg %p763_p11 }
  0x15   : > { %p584_p10 = por %p583_p7, %p582_p5 }
  0x16   : > { %p577_p0 = pnand %p575_p13, %p565_p12 }
  0x18   : > { %p578_p3 = pneg %p577_p0 }
  0x1a   : > { %p585_p2 = pnand %p584_p10, %p578_p3 }
  0x1c   : > { %588 = shalt.err (!%p585_p2)
}
  0x1d   : > { %s688_s28 = smov 64   ;;  %s689_s29 = smov 4  }
  0x1e   : > { %501 = dma.hbm_to_vmem [thread:$0]  (!%p763_p11), %s876_s1, 1024, %s132_s22, [#allocation6], %s688_s28, %s688_s28, %s689_s29  }
  0x1f   : > { %p25_p9 = scmp.eq.s32.totalorder %s24_s26, 0  ;;  %p34_p12 = scmp.ne.s32.totalorder %s681_s14, %s677_s13 }
  0x20   : > { %p35_p10 = scmp.eq.s32.totalorder %s685_s15, 0  ;;  %p511_p2 = scmp.lt.s32.totalorder %s685_s15, 2 }
  0x21   : > { %s785_s5 = scalar_select %p25_p9, %s681_s14, %s27_s25  }
  0x22   : > { %p36_p13 = por %p35_p10, %p34_p12  ;;  %p887_p0 = scmp.eq.s32.totalorder %s735_s16, 1 }
  0x23   : > { %s148_s7 = sand.u32 1, %s681_s14   ;;  %s443_s8 = sshll.u32 %s685_s15, 6 }
  0x24   : > { %p789_p3 = por %p887_p0, %p34_p12  ;;  %s442_s9 = sshll.u32 %s148_s7, 2 }
  0x25   : > { %s798_s17 = scalar_lea.hbm %s875_s0, %s443_s8  ;;  %s152_s21 = scalar_lea.vmem [#allocation2], %s442_s9 }
  0x26   : > { %s888_s6 = scalar_select %p789_p3, 1, 0 }
  0x27   : > { %s159_s22 = sshll.u32 %s152_s21, 4  ;;  %p800_p11 = pnand %p511_p2, %p36_p13  ;;  %s160_s22 = int_to_ptr.vmem [resolvable:$true] %s159_s22 }
  0x28   : > { %s149_s25 = scalar_lea.sflag [#allocation3], %s148_s7  ;;  %s589_s26 = scalar_lea.hbm %s798_s17, 64 }
  0x29   : > { %p590_p5 = scmp.ne.s32.totalorder %s798_s17, %s589_s26  ;;  %p591_p7 = pneg %p800_p11 }
  0x2a   : > { %s594_s29 = scalar_lea.hbm %s875_s0, 128  ;;  %p595_p10 = scmp.lt.s32.totalorder %s798_s17, %s875_s0 }
  0x2b   : > { %p592_p9 = pnand %p591_p7, %p590_p5  ;;  %p596_p2 = scmp.lt.s32.totalorder %s594_s29, %s589_s26 }
  0x2d   : > { %p593_p12 = pneg %p592_p9  ;;  %p597_p13 = por %p596_p2, %p595_p10 }
  0x2f   : > { %p598_p0 = pnand %p597_p13, %p593_p12 }
  0x31   : > { %601 = shalt.err (!%p598_p0)
}
  0x32   : > { %s602_s8 = scalar_lea.vmem %s160_s22, 64  ;;  %s690_s7 = smov [#allocation2]  }
  0x33   : > { %p603_p1 = scmp.ne.s32.totalorder %s160_s22, %s602_s8  ;;  %s607_s9 = sshll.u32 %s690_s7, 4  ;;  %s608_s9 = int_to_ptr.vmem [resolvable:$false] %s607_s9 }
  0x34   : > { %s609_s10 = scalar_lea.vmem %s608_s9, 128  ;;  %p610_p5 = scmp.lt.s32.totalorder %s160_s22, %s608_s9 }
  0x35   : > { %p605_p6 = pnand %p603_p1, %p591_p7  ;;  %p611_p9 = scmp.lt.s32.totalorder %s609_s10, %s602_s8 }
  0x37   : > { %p606_p3 = pneg %p605_p6  ;;  %p612_p4 = por %p611_p9, %p610_p5 }
  0x39   : > { %p613_p8 = pnand %p612_p4, %p606_p3 }
  0x3b   : > { %616 = shalt.err (!%p613_p8)
}
  0x3c   : > { %505 = dma.hbm_to_vmem [thread:$0]  (!%p800_p11), %s798_s17, 64, %s160_s22, %s149_s25  }
  0x3d   : > { %p890_p12 = scmp.ne.s32.totalorder %s885_s20, 0 }
  0x3e   : > { %s821_s11 = sand.u32 (!%p890_p12), 1, %s677_s13   ;;  %p891_p1 = scmp.ne.s32.totalorder (!%p890_p12), %s883_s18, 0 }
  0x3f   : > { %168 = sbr.rel (%p890_p12) target bundleno = 366 (0x16e), region = 32  ;;  %s445_s21 = sshll.u32 (!%p890_p12), %s821_s11, 2 }
  0x40   : > { %s171_s26 = scalar_lea.sflag (!%p890_p12), [#allocation3], %s821_s11  ;;  %s825_s27 = scalar_lea.vmem (!%p890_p12), [#allocation2], %s445_s21 }
  0x44   : > { %660 = dma.done.wait (%p891_p1), %s171_s26, 64  }
  0x45   : > { %662 = vsyncadd (%p891_p1), %s171_s26, 4294967232  ;;  %p892_p4 = scmp.eq.s32.totalorder %s735_s16, 0 }
  0x47   : > { %664 = dma.done.wait (%p892_p4), [#allocation6], 1024   ;;  %p893_p6 = pmov %p892_p4 }
  0x48   : > { %v691_v0 = vmov 0.0   ;;  %vm692_vm0 = vmmov 0   ;;  %v551_v1 = vld [vmem:[#allocation5 + $0x38] sm:$0xff]   ;;  %v552_v2 = vld [vmem:[#allocation5 + $0x30] sm:$0xff]   ;;  %v553_v3 = vld [vmem:[#allocation5 + $0x28] sm:$0xff]   ;;  %s447_s17 = sshll.u32 %s821_s11, 3 }
  0x49   : > { %666 = vsyncadd (%p893_p6), [#allocation6], 4294966272  ;;  %470 = vmatprep.subr.bf16.mxu0 %v691_v0  ;;  %486 = vmatprep.mubr.msk.bf16.mxu0 %vm692_vm0, %v691_v0  ;;  %v554_v4 = vld [vmem:[#allocation5 + $0x20] sm:$0xff]   ;;  %v555_v5 = vld [vmem:[#allocation5 + $0x18] sm:$0xff]   ;;  %s458_s22 = sshll.u32 %s735_s16, 7  ;;  %s200_s23 = scalar_lea.vmem [#allocation7], %s447_s17 }
  0x4a   : > { %471 = vmatpush3.bf16.msra.mxu0 %v551_v1  ;;  %v556_v6 = vld [vmem:[#allocation5 + $0x10] sm:$0xff]   ;;  %v557_v7 = vld [vmem:[#allocation5 + $0x8] sm:$0xff]   ;;  %v558_v8 = vld [vmem:[#allocation5] sm:$0xff]   ;;  %s358_s25 = sshll.u32 %s200_s23, 4  ;;  %s356_s30 = scalar_lea.hbm %s878_s3, %s458_s22  ;;  %s359_s25 = int_to_ptr.vmem [resolvable:$true] %s358_s25 }
  0x4b   : > { %472 = vmatprep.subr.bf16.mxu0 %v691_v0  ;;  %v202_v9 = vld [vmem:[%s825_s27] sm:$0xf]  ;;  %s345_s4 = scalar_lea.sflag [#allocation4], %s821_s11  ;;  %s617_s8 = scalar_lea.vmem %s359_s25, 128 }
  0x4c   : > { %v448_v10 = vld [vmem:[%s877_s2] ss:$0 sm:$0xff]  ;;  %v341_v38 = vunpack.c.l.bf16 %v202_v9  ;;  %p618_p8 = scmp.ne.s32.totalorder %s359_s25, %s617_s8  ;;  %p894_p3 = scmp.ne.s32.totalorder %s888_s6, 0 }
  0x4d   : > { %s693_s7 = smov [#allocation7]  }
  0x4e   : > { %473 = vmatpush3.bf16.msra.mxu0 %v552_v2  ;;  %p619_p11 = pnand %p618_p8, %p894_p3  ;;  %s621_s9 = sshll.u32 %s693_s7, 4  ;;  %s622_s9 = int_to_ptr.vmem [resolvable:$false] %s621_s9 }
  0x4f   : > { %474 = vmatprep.subr.bf16.mxu0 %v691_v0  ;;  %s623_s16 = scalar_lea.vmem %s622_s9, 256  ;;  %p624_p10 = scmp.lt.s32.totalorder %s359_s25, %s622_s9 }
  0x50   : > { %p620_p7 = pneg %p619_p11  ;;  %p625_p2 = scmp.lt.s32.totalorder %s623_s16, %s617_s8 }
  0x52   : > { %475 = vmatpush3.bf16.msra.mxu0 %v553_v3  ;;  %p626_p13 = por %p625_p2, %p624_p10 }
  0x53   : > { %476 = vmatprep.subr.bf16.mxu0 %v691_v0 }
  0x54   : > { %p627_p0 = pnand %p626_p13, %p620_p7 }
  0x56   : > { %477 = vmatpush3.bf16.msra.mxu0 %v554_v4 }
  0x57   : > { %478 = vmatprep.subr.bf16.mxu0 %v691_v0 }
  0x5a   : > { %479 = vmatpush3.bf16.msra.mxu0 %v555_v5 }
  0x5b   : > { %480 = vmatprep.subr.bf16.mxu0 %v691_v0 }
  0x5e   : > { %481 = vmatpush3.bf16.msra.mxu0 %v556_v6 }
  0x5f   : > { %482 = vmatprep.subr.bf16.mxu0 %v691_v0 }
  0x62   : > { %483 = vmatpush3.bf16.msra.mxu0 %v557_v7 }
  0x63   : > { %484 = vmatprep.subr.bf16.mxu0 %v691_v0 }
  0x66   : > { %485 = vmatpush3.bf16.msra.mxu0 %v558_v8 }
  0x69   : > { %487 = vmatmul.mubr.bf16.vlgmr.msra.gmra.mxu0 %v202_v9 }
 0x129   : > { %v308_v11 = vpop.f32.mrf.mxu0 }
 0x12a   : > { %v309_v12 = vadd.f32 %v448_v10, %v308_v11 }
 0x12b   : > { %v488_v13 = vpop.f32.mrf.mxu0 }
 0x12c   : > { %v315_v14 = vmul.f32 0.70710677, %v309_v12  ;;  %v314_v39 = vmul.f32 0.5, %v309_v12 }
 0x12d   : > { %v311_v15 = vpop.f32.mrf.mxu0 }
 0x12e   : > { %v316_v16 = vand.u32 2147483647, %v315_v14  ;;  %vm336_vm1 = vcmp.ge.f32.partialorder %v315_v14, 0.0 }
 0x12f   : > { %v489_v17 = vpop.f32.mrf.mxu0 }
 0x130   : > { %v317_v18 = vmul.f32 0.3275911, %v316_v16  ;;  %v330_v20 = vsub.f32 0.0, %v316_v16 }
 0x132   : > { %v318_v19 = vadd.f32 1.0, %v317_v18  ;;  %v331_v21 = vmul.f32 %v330_v20, %v316_v16 }
 0x134   : > { %559 = vrcp.f32 %v318_v19  ;;  %v332_v24 = vmul.f32 1.442695, %v331_v21 }
 0x136   : > { %561 = vpow2.f32 %v332_v24 }
 0x141   : > { %v560_v22 = vpop.eup %559 }
 0x142   : > { %v321_v23 = vmul.f32 1.0614054, %v560_v22 }
 0x143   : > { %v562_v33 = vpop.eup %561 }
 0x144   : > { %v322_v25 = vadd.f32 -1.4531521, %v321_v23 }
 0x146   : > { %v323_v26 = vmul.f32 %v560_v22, %v322_v25 }
 0x148   : > { %v324_v27 = vadd.f32 1.4214138, %v323_v26 }
 0x14a   : > { %v325_v28 = vmul.f32 %v560_v22, %v324_v27 }
 0x14c   : > { %v326_v29 = vadd.f32 -0.28449672, %v325_v28 }
 0x14e   : > { %v327_v30 = vmul.f32 %v560_v22, %v326_v29 }
 0x150   : > { %v328_v31 = vadd.f32 0.2548296, %v327_v30 }
 0x152   : > { %v329_v32 = vmul.f32 %v560_v22, %v328_v31 }
 0x154   : > { %v334_v34 = vmul.f32 %v562_v33, %v329_v32 }
 0x156   : > { %v335_v35 = vsub.f32 1.0, %v334_v34 }
 0x158   : > { %v337_v36 = vsub.f32 0.0, %v335_v35 }
 0x15a   : > { %v338_v37 = vsel %vm336_vm1, %v335_v35, %v337_v36 }
 0x15b   : > { %v339_v40 = vadd.f32 1.0, %v338_v37 }
 0x15d   : > { %v340_v41 = vmul.f32 %v339_v40, %v314_v39 }
 0x15f   : > { %v342_v42 = vadd.f32 %v341_v38, %v340_v41 }
 0x161   : > { %343 = vst [vmem:[%s200_s23] sm:$0xff] %v342_v42 }
 0x162   : > { %630 = shalt.err (!%p627_p0)
}
 0x163   : > { %s631_s10 = scalar_lea.hbm %s356_s30, 128  ;;  %s635_s26 = scalar_lea.hbm %s878_s3, 256 }
 0x164   : > { %p632_p5 = scmp.ne.s32.totalorder %s356_s30, %s631_s10  ;;  %p636_p1 = scmp.lt.s32.totalorder %s356_s30, %s878_s3 }
 0x165   : > { %p637_p4 = scmp.lt.s32.totalorder %s635_s26, %s631_s10 }
 0x166   : > { %p633_p9 = pnand %p632_p5, %p894_p3 }
 0x167   : > { %p638_p6 = por %p637_p4, %p636_p1 }
 0x168   : > { %p634_p12 = pneg %p633_p9 }
 0x16a   : > { %p639_p8 = pnand %p638_p6, %p634_p12 }
 0x16c   : > { %642 = shalt.err (!%p639_p8)
}
 0x16d   : > { %496 = dma.vmem_to_hbm [thread:$0]  (%p894_p3), %s359_s25, 128, %s356_s30, %s345_s4  }
 0x16e PF: > { %s370_s20 = sand.u32 1, %s673_s12   ;;  %p895_p11 = scmp.ne.s32.totalorder %s884_s19, 0 }
 0x16f   : > { %p896_p7 = scmp.ge.s32.totalorder %s685_s15, 2  ;;  %s371_s17 = scalar_lea.sflag [#allocation4], %s370_s20 }
 0x171   : > { %p507_p10 = pnand %p896_p7, %p895_p11 }
 0x173   : > { %p508_p2 = pneg %p507_p10 }
 0x175   : > { %668 = dma.done.wait (%p508_p2), %s371_s17, 128  }
 0x176   : > { %670 = vsyncadd (%p508_p2), %s371_s17, 4294967168  ;;  %p17_p13 = scmp.ge.s32.totalorder %s768_s24, 4   ;;  %s897_s12 = smov %s677_s13 }
 0x177   : > { %s898_s13 = smov %s681_s14  ;;  %s899_s14 = smov %s785_s5 }
 0x178   : > { %s900_s15 = smov %s768_s24  ;;  %19 = sbr.rel (!%p17_p13) target bundleno = 6 (0x6), region = 81 }
 0x17d   :  { %376 = vsyncpa [#allocation3], 1 }
 0x17e   :  { %378 = vsyncpa [#allocation3 + $0x1], 1 }
 0x17f   :  { %379 = vsyncpa [#allocation6], 1 }
 0x180   :  { %380 = vsyncpa [#allocation4], 1 }
 0x181   :  { %382 = vsyncpa [#allocation4 + $0x1], 1 }

</bundles_post_ra>
